<compile_context>
chip_gen: v6e
topology: v6e:2x2x1
jax: 0.10.0
libtpu: 0.0.40
codegen_flags: <defaults>
</compile_context>

<pallas_src>
import jax
import jax.numpy as jnp
from jax import lax
from jax.experimental import pallas as pl
from jax.experimental.pallas import tpu as pltpu

# ---- problem sizes (small, consistent with the module) ----------------------
N, CIN, H, W = 2, 4, 16, 16      # input NCHW = (2, 4, 16, 16)
COUT = 8                          # out channels
KS = 3                            # filter_size
PAD = 1                           # padding
EPS = 1e-5                        # BatchNorm2d eps
NEG_SLOPE = 0.1                   # LeakyReLU slope
HO, WO = H // 2, W // 2           # MaxPool2d(2, stride=2, pad=0) output spatial
P = N * HO * WO                   # 128 pooled pixels (lane-dense output width)
R = 4 * P                         # 512 conv-output pixels (= N*H*W)
KC = KS * KS * CIN                # 36 im2col rows (taps x in-channels)
PCOLS = KC + 2                    # weight columns + gamma + beta


def conv_bn_act_pool_kernel(xcol_ref, params_ref, out_ref):
    """Fused Conv(3x3) + BatchNorm(train) + LeakyReLU(0.1) + MaxPool(2x2,s2).

    xcol_ref  : (KC, R)       bf16  im2col activations; column = q*P + p with
                                    q = 2x2-pool-window position (dy*2+dx),
                                    p = flat (n, h', w')
    params_ref: (COUT, KC+2)  f32   [:, :KC] conv weights (rows cout, cols (ky,kx,cin)),
                                    [:, KC] gamma, [:, KC+1] beta
    out_ref   : (COUT, P)     f32   pooled output, lane-dense (8, 128)
    """
    # Static slices on a VMEM ref are free; cast the weight tile to bf16 so the
    # MXU sees its native operand dtype (gamma/beta stay exact f32).
    w = params_ref[:, 0:KC].astype(jnp.bfloat16)            # (COUT, KC)
    gamma = params_ref[:, KC:KC + 1]                        # (COUT, 1) f32
    beta = params_ref[:, KC + 1:KC + 2]                     # (COUT, 1) f32

    # ---- Conv2d: single MXU matmul, bf16 x bf16 -> f32 accumulation ----------
    acc = jnp.dot(w, xcol_ref[...],
                  preferred_element_type=jnp.float32)       # (COUT, R) f32

    # ---- BatchNorm2d (training mode, biased batch stats), single pass --------
    # E[x^2]-mean^2 is fine at this activation scale and matches PyTorch's
    # biased train-mode stats; switch to the two-pass form if templated onto
    # layers with much larger activations (cancellation risk).
    inv_r = jnp.float32(1.0 / R)
    mean = jnp.sum(acc, axis=1, keepdims=True) * inv_r      # (COUT, 1)
    ex2 = jnp.sum(acc * acc, axis=1, keepdims=True) * inv_r # (COUT, 1)
    var = ex2 - mean * mean                                 # biased variance
    scale = gamma * lax.rsqrt(var + EPS)                    # EUP slot
    shift = beta - mean * scale
    y = acc * scale + shift                                 # (COUT, R)

    # ---- LeakyReLU(0.1): identical to where(y>=0, y, 0.1*y) for slope in (0,1)
    y = jnp.maximum(y, NEG_SLOPE * y)

    # ---- MaxPool2d(2, stride=2): 4 aligned contiguous lane slabs of width P --
    pooled = jnp.maximum(jnp.maximum(y[:, 0 * P:1 * P], y[:, 1 * P:2 * P]),
                         jnp.maximum(y[:, 2 * P:3 * P], y[:, 3 * P:4 * P]))
    out_ref[...] = pooled                                   # (COUT, P) = (8, 128)


@jax.jit
def conv_layer_forward(x_nchw, w_oihw, gamma, beta):
    """Wrapper: NCHW in -> NCHW out. Wrapper does layout plumbing only (pad,
    im2col gather, param packing, final transpose); all arithmetic is in the
    kernel. allow_input_fusion lets XLA fuse this plumbing into the call."""
    # bf16 MXU operand slab (cast early so any materialized intermediate is bf16)
    x = x_nchw.astype(jnp.bfloat16)
    xpad = jnp.pad(x, ((0, 0), (0, 0), (PAD, PAD), (PAD, PAD)))  # (N, CIN, H+2, W+2)

    # im2col: taps[tap, n, c, h, w] = xpad[n, c, h+ky, w+kx], tap = ky*KS+kx
    taps = jnp.stack([xpad[:, :, ky:ky + H, kx:kx + W]
                      for ky in range(KS) for kx in range(KS)], axis=0)  # (9,N,CIN,H,W)
    # split spatial into pool coords: h = 2h'+dy, w = 2w'+dx
    taps = taps.reshape(KS * KS, N, CIN, HO, 2, WO, 2)
    # rows = (tap, cin); cols = (q=(dy,dx), n, h', w')  ->  lane-dense (36, 512)
    xcol = jnp.transpose(taps, (0, 2, 4, 6, 1, 3, 5)).reshape(KC, R)

    # params slab: conv weights OIHW -> (COUT, (ky,kx,cin)) plus gamma/beta cols
    wmat = jnp.transpose(w_oihw.astype(jnp.float32), (0, 2, 3, 1)).reshape(COUT, KC)
    params = jnp.concatenate(
        [wmat,
         gamma.reshape(COUT, 1).astype(jnp.float32),
         beta.reshape(COUT, 1).astype(jnp.float32)], axis=1)     # (COUT, KC+2) f32

    cost = pl.CostEstimate(
        flops=2 * COUT * KC * R + 8 * COUT * R,
        transcendentals=COUT,
        bytes_accessed=2 * KC * R + 4 * COUT * PCOLS + 4 * COUT * P)

    # Single invocation, no grid: whole problem is a few tens of KB and fits
    # VMEM trivially on v5e/v6e/v7x.
    out = pl.pallas_call(
        conv_bn_act_pool_kernel,
        out_shape=jax.ShapeDtypeStruct((COUT, P), jnp.float32),
        in_specs=[pl.BlockSpec(memory_space=pltpu.MemorySpace.VMEM),
                  pl.BlockSpec(memory_space=pltpu.MemorySpace.VMEM)],
        out_specs=pl.BlockSpec(memory_space=pltpu.MemorySpace.VMEM),
        cost_estimate=cost,
        compiler_params=pltpu.CompilerParams(
            allow_input_fusion=[True, True]),
    )(xcol, params)

    # (COUT, P) -> (COUT, N, HO, WO) -> NCHW
    return jnp.transpose(out.reshape(COUT, N, HO, WO), (1, 0, 2, 3))


def reference_forward(x_nchw, w_oihw, gamma, beta):
    """Pure-JAX reference matching PyTorch forward semantics (f32)."""
    y = lax.conv_general_dilated(
        x_nchw.astype(jnp.float32), w_oihw.astype(jnp.float32),
        window_strides=(1, 1), padding=((PAD, PAD), (PAD, PAD)),
        dimension_numbers=('NCHW', 'OIHW', 'NCHW'),
        precision=lax.Precision.HIGHEST)
    mean = jnp.mean(y, axis=(0, 2, 3), keepdims=True)
    var = jnp.mean((y - mean) ** 2, axis=(0, 2, 3), keepdims=True)
    y = (y - mean) / jnp.sqrt(var + EPS) * gamma.reshape(1, -1, 1, 1) \
        + beta.reshape(1, -1, 1, 1)
    y = jnp.where(y >= 0, y, NEG_SLOPE * y)
    y = lax.reduce_window(y, jnp.float32(-jnp.inf), lax.max,
                          (1, 1, 2, 2), (1, 1, 2, 2), 'VALID')
    return y


if __name__ == "__main__":
    key = jax.random.PRNGKey(0)
    kx_, kw_, kg_, kb_ = jax.random.split(key, 4)

    x = jax.random.normal(kx_, (N, CIN, H, W), jnp.float32)

    # Conv2d(in_C=4, out_C=8, 3, bias=False since bn=True): kaiming-uniform-style bound
    fan_in = CIN * KS * KS
    bound = 1.0 / (fan_in ** 0.5)
    w = jax.random.uniform(kw_, (COUT, CIN, KS, KS), jnp.float32, -bound, bound)

    # Non-trivial (but realistic) BN affine params to exercise the packed path.
    gamma = jax.random.uniform(kg_, (COUT,), jnp.float32, 0.75, 1.25)
    beta = jax.random.uniform(kb_, (COUT,), jnp.float32, -0.5, 0.5)

    out = jax.block_until_ready(conv_layer_forward(x, w, gamma, beta))
    assert out.shape == (N, COUT, HO, WO), out.shape

    # Check 1: against the full-f32 reference. Gate reflects bf16 MXU operands
    # (f32 accumulation); expected max err ~1e-2 here.
    ref_f32 = reference_forward(x, w, gamma, beta)
    err_f32 = float(jnp.max(jnp.abs(out - ref_f32)))
    assert err_f32 < 3e-2, f"max abs err vs f32 reference too large: {err_f32}"

    # Check 2: against a reference whose conv operands are rounded to bf16 the
    # same way the kernel's are -- validates the kernel mechanics tightly.
    x_q = x.astype(jnp.bfloat16).astype(jnp.float32)
    w_q = w.astype(jnp.bfloat16).astype(jnp.float32)
    ref_bf16 = reference_forward(x_q, w_q, gamma, beta)
    err_bf16 = float(jnp.max(jnp.abs(out - ref_bf16)))
    assert err_bf16 < 2e-3, f"max abs err vs bf16-operand reference too large: {err_bf16}"

    print("KERNEL_OK")
</pallas_src>

<mosaic_0001>
module attributes {stable_mosaic.version = 11 : i64} {
  func.func @conv_bn_act_pool_kernel(%arg0: memref<36x512xbf16, #tpu.memory_space<vmem>>, %arg1: memref<8x38xf32, #tpu.memory_space<vmem>>, %arg2: memref<8x128xf32, #tpu.memory_space<vmem>>) attributes {dimension_semantics = [], scalar_prefetch = 0 : i64, scratch_operands = 0 : i64, tpu.core_type = #tpu.core_type<tc>} {
    %c0 = arith.constant 0 : index
    %c0_0 = arith.constant 0 : index
    %0 = vector.load %arg1[%c0, %c0_0] : memref<8x38xf32, #tpu.memory_space<vmem>>, vector<8x36xf32>
    %1 = arith.truncf %0 : vector<8x36xf32> to vector<8x36xbf16>
    %c0_1 = arith.constant 0 : index
    %c36 = arith.constant 36 : index
    %2 = vector.load %arg1[%c0_1, %c36] : memref<8x38xf32, #tpu.memory_space<vmem>>, vector<8x1xf32>
    %c0_2 = arith.constant 0 : index
    %c37 = arith.constant 37 : index
    %3 = vector.load %arg1[%c0_2, %c37] : memref<8x38xf32, #tpu.memory_space<vmem>>, vector<8x1xf32>
    %c0_3 = arith.constant 0 : index
    %c0_4 = arith.constant 0 : index
    %4 = vector.load %arg0[%c0_3, %c0_4] : memref<36x512xbf16, #tpu.memory_space<vmem>>, vector<36x512xbf16>
    %cst = arith.constant dense<0.000000e+00> : vector<8x512xf32>
    %5 = tpu.matmul %1, %4, %cst {dimension_numbers = #tpu.dot_dimension_numbers<[1], [0], [0], [1], [0, 0, 1, 1], [], []>} : vector<8x36xbf16>, vector<36x512xbf16>, vector<8x512xf32> -> vector<8x512xf32>
    %cst_5 = arith.constant dense<0.000000e+00> : vector<8xf32>
    %6 = vector.multi_reduction <add>, %5, %cst_5 [1] : vector<8x512xf32> to vector<8xf32>
    %7 = vector.shape_cast %6 : vector<8xf32> to vector<8x1xf32>
    %cst_6 = arith.constant 0.001953125 : f32
    %8 = vector.broadcast %cst_6 : f32 to vector<8x1xf32>
    %9 = arith.mulf %7, %8 : vector<8x1xf32>
    %10 = arith.mulf %5, %5 : vector<8x512xf32>
    %cst_7 = arith.constant dense<0.000000e+00> : vector<8xf32>
    %11 = vector.multi_reduction <add>, %10, %cst_7 [1] : vector<8x512xf32> to vector<8xf32>
    %12 = vector.shape_cast %11 : vector<8xf32> to vector<8x1xf32>
    %cst_8 = arith.constant 0.001953125 : f32
    %13 = vector.broadcast %cst_8 : f32 to vector<8x1xf32>
    %14 = arith.mulf %12, %13 : vector<8x1xf32>
    %15 = arith.mulf %9, %9 : vector<8x1xf32>
    %16 = arith.subf %14, %15 : vector<8x1xf32>
    %cst_9 = arith.constant 9.99999974E-6 : f32
    %17 = vector.broadcast %cst_9 : f32 to vector<8x1xf32>
    %18 = arith.addf %16, %17 : vector<8x1xf32>
    %19 = math.rsqrt %18 : vector<8x1xf32>
    %20 = arith.mulf %2, %19 : vector<8x1xf32>
    %21 = arith.mulf %9, %20 : vector<8x1xf32>
    %22 = arith.subf %3, %21 : vector<8x1xf32>
    %23 = vector.broadcast %20 : vector<8x1xf32> to vector<8x512xf32>
    %24 = arith.mulf %5, %23 : vector<8x512xf32>
    %25 = vector.broadcast %22 : vector<8x1xf32> to vector<8x512xf32>
    %26 = arith.addf %24, %25 : vector<8x512xf32>
    %cst_10 = arith.constant 1.000000e-01 : f32
    %27 = vector.broadcast %cst_10 : f32 to vector<8x512xf32>
    %28 = arith.mulf %27, %26 : vector<8x512xf32>
    %29 = arith.maximumf %26, %28 : vector<8x512xf32>
    %30 = vector.extract_strided_slice %29 {offsets = [0, 0], sizes = [8, 128], strides = [1, 1]} : vector<8x512xf32> to vector<8x128xf32>
    %31 = vector.extract_strided_slice %29 {offsets = [0, 128], sizes = [8, 128], strides = [1, 1]} : vector<8x512xf32> to vector<8x128xf32>
    %32 = arith.maximumf %30, %31 : vector<8x128xf32>
    %33 = vector.extract_strided_slice %29 {offsets = [0, 256], sizes = [8, 128], strides = [1, 1]} : vector<8x512xf32> to vector<8x128xf32>
    %34 = vector.extract_strided_slice %29 {offsets = [0, 384], sizes = [8, 128], strides = [1, 1]} : vector<8x512xf32> to vector<8x128xf32>
    %35 = arith.maximumf %33, %34 : vector<8x128xf32>
    %36 = arith.maximumf %32, %35 : vector<8x128xf32>
    %c0_11 = arith.constant 0 : index
    %c0_12 = arith.constant 0 : index
    %37 = vector.load %arg2[%c0_11, %c0_12] : memref<8x128xf32, #tpu.memory_space<vmem>>, vector<8x128xf32>
    tpu.vector_store %arg2[%c0_11, %c0_12], %36 {strides = array<i32>} : memref<8x128xf32, #tpu.memory_space<vmem>>, vector<8x128xf32>,
    return
  }
}

</mosaic_0001>

<bundles_post_ra>
// kernel: conv_layer_forward.2
= control target key start
LH: loop header
LB: loop body
LE: loop exit
PB: predicated region body
PF: predicated region fallthrough
CT: control target
= control target key end

     0   :  { %v79_v1 = vlaneseq  ;;  %vm189_vm0 = vcmask 1041408   ;;  %v399_v14 = vmov 0   ;;  %s400_s14 = smov 36   ;;  %s401_s17 = smov 37   ;;  %vm185_vm5 = vcmask 293888   ;;  %s484_s0 = inlined_call_operand.vmem [shape: bf16[36,512], index: 0, kind: input, shape index: {}]   ;;  %s485_s1 = inlined_call_operand.vmem [shape: f32[8,1], index: 1, kind: input, shape index: {}]   ;;  %s486_s2 = inlined_call_operand.<no memory space> [shape: f32[], index: 2, kind: input, shape index: {}]   ;;  %s487_s3 = inlined_call_operand.vmem [shape: f32[8,1], index: 3, kind: input, shape index: {}]   ;;  %s488_s4 = inlined_call_operand.vmem [shape: f32[8,36], index: 4, kind: input, shape index: {}]   ;;  %s489_s5 = inlined_call_operand.vmem [shape: f32[8,128], index: 5, kind: output, shape index: {}]  }
   0x1   :  { %v10_v0 = vstv %s486_s2  ;;  %v133_v2 = vld [vmem:[%s484_s0 + $0x40] sm:$0x33]  ;;  %v134_v4 = vld [vmem:[%s484_s0 + $0x48] sm:$0x33]  ;;  %234 = vmatprep.mubr.bf16.mxu0 %v399_v14  ;;  %275 = vmatprep.mubr.bf16.mxu1 %v399_v14  ;;  %v402_v52 = vmov 36   ;;  %v403_v60 = vmov 37  }
   0x2   :  { %v366_v3 = vcombine.high %v133_v2, %v133_v2  ;;  %v365_v5 = vcombine.low %v133_v2, %v133_v2  ;;  %v80_v6 = vand.u32 127, %v79_v1  ;;  %v93_v7 = vld [vmem:[%s487_s3] sm:$0xff]  ;;  %v368_v8 = vcombine.high %v134_v4, %v134_v4  ;;  %v387_v13 = vld [vmem:[%s484_s0 + $0x2c] ss:$16 sps:$4 sm:$0xff]   ;;  %v390_v18 = vld [vmem:[%s484_s0 + $0x28] ss:$16 sps:$4 sm:$0xff]   ;;  %379 = vset.pattern.permute.xlu1 %v402_v52  ;;  %380 = vset.pattern.permute.xlu0 %v403_v60 }
   0x3   :  { %v367_v9 = vcombine.low %v134_v4, %v134_v4  ;;  %v385_v10 = vld [vmem:[%s484_s0 + $0x24] ss:$16 sps:$4 sm:$0xff]   ;;  %v389_v17 = vld [vmem:[%s484_s0 + $0x20] ss:$16 sps:$4 sm:$0xff]   ;;  %v393_v20 = vld [vmem:[%s484_s0 + $0xc] ss:$16 sps:$4 sm:$0xff]  }
   0x4   :  { %v78_v11 = vld [vmem:[%s485_s1] sm:$0xff]  ;;  %369 = vmatprep.subr.msk.bf16.mxu0 %vm189_vm0, %v366_v3  ;;  %v191_v12 = vsel %vm189_vm0, %v365_v5, 0  ;;  %v81_v15 = vadd.s32 128, %v80_v6  ;;  %371 = vmatprep.subr.msk.bf16.mxu1 %vm189_vm0, %v368_v8  ;;  %vm101_vm1 = vcmp.lt.s32.totalorder %v80_v6, 92  ;;  %vm86_vm3 = vcmp.lt.s32.totalorder %v80_v6, 91 }
   0x5   :  { %213 = vmatpush1.bf16.msra.mxu0 %v191_v12  ;;  %v197_v16 = vsel %vm189_vm0, %v367_v9, 0  ;;  %v391_v19 = vld [vmem:[%s484_s0 + $0x4] ss:$16 sps:$4 sm:$0xff]   ;;  %v395_v24 = vld [vmem:[%s484_s0] ss:$16 sps:$4 sm:$0xff]   ;;  %vm109_vm4 = vcmp.lt.s32.totalorder %v80_v6, 36 }
   0x6   :  { %254 = vmatpush1.bf16.msra.mxu1 %v197_v16  ;;  %214 = vmatprep.subr.bf16.mxu0 %v385_v10  ;;  %vm82_vm2 = vcmp.lt.s32.totalorder %v81_v15, 129  ;;  %v396_v25 = vld [vmem:[%s484_s0 + $0x8] ss:$16 sps:$4 sm:$0xff]   ;;  %v105_v27 = vld [vmem:[%s488_s4] sm:$0xff]  ;;  %s404_s0 = smov 1  }
   0x7   :  { %255 = vmatprep.subr.bf16.mxu1 %v387_v13  ;;  %v98_v21 = vsel %vm82_vm2, %v93_v7, %v10_v0  ;;  %v83_v22 = vsel %vm82_vm2, %v78_v11, %v10_v0  ;;  %v110_v28 = vsel %vm109_vm4, %v105_v27, %v10_v0 }
   0x8   :  { %v102_v23 = vsel %vm101_vm1, %v98_v21, %v10_v0  ;;  %v87_v26 = vsel %vm86_vm3, %v83_v22, %v10_v0 }
   0x9   :  { %215 = vmatpush1.bf16.msra.mxu0 %v389_v17  ;;  %103 = vrot.lane.b32.xlu0 %v102_v23, %s400_s14 }
   0xa   :  { %256 = vmatpush1.bf16.msra.mxu1 %v390_v18  ;;  %216 = vmatprep.subr.bf16.mxu0 %v391_v19 }
   0xb   :  { %257 = vmatprep.subr.bf16.mxu1 %v393_v20 }
   0xd   :  { %217 = vmatpush1.bf16.msra.mxu0 %v395_v24  ;;  %88 = vrot.lane.b32.xlu0 %v87_v26, %s401_s17 }
   0xe   :  { %258 = vmatpush1.bf16.msra.mxu1 %v396_v25 }
  0x7b   :  { %v104_v29 = vpop.permute.xlu0 %103 }
  0x7c   :  { %v113_v30 = vmax.f32 %v110_v28, %v104_v29 }
  0x7f   :  { %v89_v31 = vpop.permute.xlu0 %88 }
  0x80   :  { %v117_v32 = vmax.f32 %v113_v30, %v89_v31 }
  0x82   :  { %v124_v33 = vpack.c.bf16 %v117_v32, %v117_v32 }
  0x84   :  { %370 = vmatmul.mubr.msk.bf16.vlgmr.msra.gmra.mxu0 %vm185_vm5, %v124_v33  ;;  %372 = vmatmul.mubr.msk.bf16.vlgmr.msra.gmra.mxu1 %vm185_vm5, %v124_v33 }
 0x144   :  { %v236_v34 = vpop.f32.mrf.mxu0  ;;  %v277_v35 = vpop.f32.mrf.mxu1 }
 0x145   :  { %v290_v38 = vmul.f32 %v236_v34, %v236_v34  ;;  %v292_v43 = vmul.f32 %v277_v35, %v277_v35 }
 0x146   :  { %v238_v36 = vpop.f32.mrf.mxu0  ;;  %v279_v37 = vpop.f32.mrf.mxu1 }
 0x147   :  { %v284_v39 = vadd.f32 %v238_v36, %v236_v34  ;;  %v291_v40 = vmul.f32 %v238_v36, %v238_v36  ;;  %v293_v50 = vmul.f32 %v279_v37, %v279_v37 }
 0x148   :  { %v240_v41 = vpop.f32.mrf.mxu0  ;;  %v281_v42 = vpop.f32.mrf.mxu1 }
 0x149   :  { %v285_v44 = vadd.f32 %v284_v39, %v277_v35  ;;  %v294_v45 = vadd.f32 %v291_v40, %v290_v38 }
 0x14a   :  { %v241_v46 = vpop.f32.mrf.mxu0  ;;  %v282_v47 = vpop.f32.mrf.mxu1 }
 0x14b   :  { %v286_v48 = vadd.f32 %v285_v44, %v279_v37  ;;  %v295_v49 = vadd.f32 %v294_v45, %v292_v43 }
 0x14d   :  { %287 = vadd.xlane.f32.xlu1 %v286_v48  ;;  %v296_v51 = vadd.f32 %v295_v49, %v293_v50 }
 0x151   :  { %297 = vadd.xlane.f32.xlu1 %v296_v51 }
 0x1d6   :  { %v288_v53 = vpop.xlane.xlu1 %287 }
 0x1d7   :  { %v289_v54 = vmul.f32 0.001953125, %v288_v53 }
 0x1d9   :  { %v300_v56 = vmul.f32 %v289_v54, %v289_v54 }
 0x1da   :  { %v298_v55 = vpop.xlane.xlu1 %297 }
 0x1db   :  { %v299_v57 = vmul.f32 0.001953125, %v298_v55 }
 0x1dd   :  { %v301_v58 = vsub.f32 %v299_v57, %v300_v56 }
 0x1df   :  { %v302_v59 = vadd.f32 1e-05, %v301_v58 }
 0x1e1   :  { %397 = vrsqrt.f32 %v302_v59 }
 0x1ee   :  { %v398_v61 = vpop.eup %397 }
 0x1ef   :  { %v304_v62 = vmul.f32 %v398_v61, %v117_v32 }
 0x1f1   :  { %313 = vperm.xlu1 %379, %v304_v62   ;;  %v305_v63 = vmul.f32 %v304_v62, %v289_v54 }
 0x1f3   :  { %307 = vrot.lane.b32.xlu0 %v305_v63, %s404_s0 }
 0x265   :  { %v308_v0 = vpop.permute.xlu0 %307 }
 0x266   :  { %v310_v1 = vsub.f32 %v117_v32, %v308_v0 }
 0x268   :  { %322 = vperm.xlu0 %380, %v310_v1  }
 0x26c   :  { %v314_v2 = vpop.permute.xlu1 %313 }
 0x26d   :  { %v316_v3 = vmul.f32 %v314_v2, %v236_v34  ;;  %v317_v4 = vmul.f32 %v314_v2, %v238_v36  ;;  %v318_v5 = vmul.f32 %v314_v2, %v277_v35  ;;  %v319_v6 = vmul.f32 %v314_v2, %v279_v37 }
 0x2e3   :  { %v323_v7 = vpop.permute.xlu0 %322 }
 0x2e4   :  { %v325_v8 = vadd.f32 %v323_v7, %v316_v3  ;;  %v326_v9 = vadd.f32 %v323_v7, %v317_v4  ;;  %v327_v10 = vadd.f32 %v323_v7, %v318_v5  ;;  %v328_v11 = vadd.f32 %v323_v7, %v319_v6 }
 0x2e6   :  { %v329_v12 = vmul.f32 0.1, %v325_v8  ;;  %v330_v13 = vmul.f32 0.1, %v326_v9  ;;  %v331_v14 = vmul.f32 0.1, %v327_v10 }
 0x2e7   :  { %v332_v15 = vmul.f32 0.1, %v328_v11 }
 0x2e8   :  { %v333_v16 = vmax.f32 %v325_v8, %v329_v12  ;;  %v334_v17 = vmax.f32 %v326_v9, %v330_v13  ;;  %v335_v18 = vmax.f32 %v327_v10, %v331_v14 }
 0x2e9   :  { %v336_v19 = vmax.f32 %v328_v11, %v332_v15 }
 0x2ea   :  { %v337_v20 = vmax.f32 %v333_v16, %v334_v17 }
 0x2eb   :  { %v338_v21 = vmax.f32 %v335_v18, %v336_v19 }
 0x2ed   :  { %v339_v22 = vmax.f32 %v337_v20, %v338_v21 }
 0x2ef   :  { %340 = vst [vmem:[%s489_s5] sm:$0xff] %v339_v22 }

</bundles_post_ra>
